<compile_context>
chip_gen: v7x
topology: tpu7x:2x2x1
jax: 0.10.0
libtpu: 0.0.40
codegen_flags: <defaults>
</compile_context>

<pallas_src>
import functools

import jax
import jax.numpy as jnp
from jax.experimental import pallas as pl
from jax.experimental.pallas import tpu as pltpu

N_AUG = 5
NOISE_FACTOR = 0.1
ENC_HIDDEN = 32   # fixed by nn.Linear(n_features, 32) in the encoder
LOGIT_PAD = 8     # extra sublane-tile of output rows holding the bag logit
SLAB_LANES = 128  # lane width of the packed parameter slab


def _mil_kernel(meta, x_ref, noise_ref, p_ref, out_ref):
    """One bag: all N_AUG augmentations folded into the sublane axis."""
    n, f = x_ref.shape
    h = meta["h"]
    a = meta["a"]
    rows = N_AUG * n

    # ---- static sub-views of the packed parameter slab ----------------------
    w1 = p_ref[meta["off_w1"]:meta["off_w1"] + f, 0:ENC_HIDDEN]            # (F, 32)
    b1 = p_ref[meta["off_b1"]:meta["off_b1"] + 1, 0:ENC_HIDDEN]            # (1, 32)
    w2 = p_ref[meta["off_w2"]:meta["off_w2"] + ENC_HIDDEN, 0:h]            # (32, H)
    b2 = p_ref[meta["off_b2"]:meta["off_b2"] + 1, 0:h]                     # (1, H)
    wvuc = p_ref[meta["off_vuc"]:meta["off_vuc"] + h, 0:2 * a + 1]         # (H, 2A+1)
    wa = p_ref[meta["off_wa"]:meta["off_wa"] + 1, 0:a]                     # (1, A)
    bc = p_ref[meta["off_bc"]:meta["off_bc"] + 1, 0:1]                     # (1, 1)

    # ---- augmented input slab: (N_AUG*N, F) ----------------------------------
    inp = (x_ref[...][None, :, :] + noise_ref[...] * NOISE_FACTOR).reshape(rows, f)

    # ---- encoder: Linear -> (Dropout=id) -> ReLU -> Linear -> (Dropout=id) -> ReLU
    h1 = jnp.dot(inp, w1, preferred_element_type=jnp.float32) + b1
    h1 = jnp.maximum(h1, 0.0)                                              # (5N, 32)
    feats = jnp.dot(h1, w2, preferred_element_type=jnp.float32) + b2
    feats = jnp.maximum(feats, 0.0)                                        # (5N, H)

    # ---- gated attention + classifier column, fused: feats @ [V | U | wc] ----
    vuc = jnp.dot(feats, wvuc, preferred_element_type=jnp.float32)         # (5N, 2A+1)
    gate = jnp.tanh(vuc[:, :a]) * jax.nn.sigmoid(vuc[:, a:2 * a])          # (5N, A)
    c_raw = vuc[:, 2 * a:2 * a + 1]                                        # (5N, 1) = feats @ wc

    # attention score: VPU broadcast-mul + XLU lane reduce (no 1-column matmul)
    score = jnp.sum(gate * wa, axis=-1, keepdims=True)                     # (5N, 1)

    # ---- per-augmentation softmax over the instance axis ---------------------
    s3 = score.reshape(N_AUG, n, 1)
    s3 = s3 - jnp.max(s3, axis=1, keepdims=True)
    e = jnp.exp(s3)
    denom = jnp.sum(e, axis=1, keepdims=True)                              # (5, 1, 1)
    r = pl.reciprocal(denom, approx=True)
    r = r * (2.0 - denom * r)        # one Newton step -> f32-accurate reciprocal
    attn = (e * r).reshape(rows, 1)                                        # (5N, 1)

    # ---- instance contributions + bag logit (no second classifier matmul) ----
    # (attn * feats) @ wc + bc == attn * (feats @ wc) + bc
    contrib = attn * c_raw + bc                                            # (5N, 1)

    inv = jnp.float32(1.0 / N_AUG)
    contrib_mean = jnp.sum(contrib.reshape(N_AUG, n, 1), axis=0) * inv     # (N, 1)
    # logit_aug = context @ wc + bc = sum_rows(contrib_aug) - (N-1)*bc
    logit_mean = jnp.sum(contrib_mean, axis=0, keepdims=True) - (n - 1) * bc  # (1, 1)

    # single merged output block: rows [0, n) = contributions, rows [n, n+8) = logit
    out_ref[0:n, :] = contrib_mean
    out_ref[n:n + LOGIT_PAD, :] = jnp.broadcast_to(logit_mean, (LOGIT_PAD, 1))


def _pack_params(params):
    """Pack all parameters into one (R, 128) f32 slab; sections 8-row aligned."""
    h = params["w2t"].shape[1]
    a = params["vt"].shape[1]
    assert ENC_HIDDEN <= SLAB_LANES and h <= SLAB_LANES and 2 * a + 1 <= SLAB_LANES

    wvuc = jnp.concatenate([params["vt"], params["ut"], params["wct"]], axis=1)  # (H, 2A+1)
    sections = [
        ("off_w1", params["w1t"]),   # (F, 32)
        ("off_b1", params["b1"]),    # (1, 32)
        ("off_w2", params["w2t"]),   # (32, H)
        ("off_b2", params["b2"]),    # (1, H)
        ("off_vuc", wvuc),           # (H, 2A+1)
        ("off_wa", params["wat"].T), # (1, A)
        ("off_bc", params["bc"]),    # (1, 1)
    ]

    meta = {"h": int(h), "a": int(a)}
    blocks = []
    off = 0
    for name, arr in sections:
        r, c = arr.shape
        pad_r = -(-r // 8) * 8
        blk = jnp.zeros((pad_r, SLAB_LANES), jnp.float32).at[:r, :c].set(arr)
        blocks.append(blk)
        meta[name] = off
        off += pad_r
    slab = jnp.concatenate(blocks, axis=0)
    return slab, meta


def test_aug_attention_mil_batched(xs, noises, params):
    """Eval-mode TTA forward for B independent bags in one pallas_call.

    xs:     (B, N, F) float32 instances
    noises: (B, N_AUG, N, F) float32 pre-sampled gaussian noise
    Returns (logits (B,), instance_contributions (B, N, 1)).
    """
    b, n, f = xs.shape
    assert noises.shape == (b, N_AUG, n, f)
    assert n % 8 == 0, "instance count must be a multiple of the sublane tile (8)"
    # TODO(synk): for bags whose size is not a multiple of 8, pad the instance
    # axis, mask padded scores to -inf before the per-aug softmax, and exclude
    # padded rows from the contrib/logit sums.

    slab, meta = _pack_params(params)
    slab_rows = slab.shape[0]
    out_rows = n + LOGIT_PAD

    kernel = functools.partial(_mil_kernel, meta)

    out = pl.pallas_call(
        kernel,
        out_shape=jax.ShapeDtypeStruct((b, out_rows, 1), jnp.float32),
        grid_spec=pltpu.PrefetchScalarGridSpec(
            num_scalar_prefetch=0,
            grid=(b,),                                            # one step per bag
            in_specs=[
                pl.BlockSpec((None, n, f), lambda i: (i, 0, 0)),          # x (bag i)
                pl.BlockSpec((None, N_AUG, n, f), lambda i: (i, 0, 0, 0)),  # noise (bag i)
                pl.BlockSpec((slab_rows, SLAB_LANES), lambda i: (0, 0)),  # packed params
            ],
            out_specs=pl.BlockSpec((None, out_rows, 1), lambda i: (i, 0, 0)),
        ),
        compiler_params=pltpu.CompilerParams(
            dimension_semantics=("parallel",)),   # v7x: bags split across the 2 TCs
    )(xs, noises, slab)

    contribs = out[:, :n, :]
    logits = out[:, n, 0]
    return logits, contribs


def test_aug_attention_mil(x, noise, params):
    """Single-bag eval-mode forward (original module signature).

    x:      (N, F), noise: (N_AUG, N, F)
    Returns (logit (1,), instance_contributions (N, 1)).
    """
    logits, contribs = test_aug_attention_mil_batched(x[None], noise[None], params)
    return logits.reshape(1), contribs[0]


def init_params(key, n_features, n_hiddens, n_att_hiddens):
    """Deterministic synthetic parameters, stored pre-transposed as (in, out)."""
    ks = jax.random.split(key, 8)
    s = 0.2
    return {
        "w1t": s * jax.random.normal(ks[0], (n_features, ENC_HIDDEN), jnp.float32),
        "b1":  s * jax.random.normal(ks[1], (1, ENC_HIDDEN), jnp.float32),
        "w2t": s * jax.random.normal(ks[2], (ENC_HIDDEN, n_hiddens), jnp.float32),
        "b2":  s * jax.random.normal(ks[3], (1, n_hiddens), jnp.float32),
        "vt":  s * jax.random.normal(ks[4], (n_hiddens, n_att_hiddens), jnp.float32),
        "ut":  s * jax.random.normal(ks[5], (n_hiddens, n_att_hiddens), jnp.float32),
        "wat": s * jax.random.normal(ks[6], (n_att_hiddens, 1), jnp.float32),
        "wct": s * jax.random.normal(ks[7], (n_hiddens, 1), jnp.float32),
        "bc":  jnp.zeros((1, 1), jnp.float32) + 0.05,
    }


def reference_forward(x, noise, p):
    """Pure-JAX reference mirroring the PyTorch eval-mode forward."""
    def get_prob(inp):
        h1 = jnp.maximum(inp @ p["w1t"] + p["b1"], 0.0)
        feats = jnp.maximum(h1 @ p["w2t"] + p["b2"], 0.0)
        vh = jnp.tanh(feats @ p["vt"])
        uh = jax.nn.sigmoid(feats @ p["ut"])
        score = ((vh * uh) @ p["wat"]).squeeze(-1)
        attn = jax.nn.softmax(score)
        weighted = attn[:, None] * feats
        contrib = weighted @ p["wct"] + p["bc"]
        context = weighted.sum(axis=0)
        logit = context @ p["wct"][:, 0] + p["bc"][0]
        return logit, contrib

    logit = jnp.zeros((1,), jnp.float32)
    contribs = 0.0
    for i in range(N_AUG):
        l, c = get_prob(x + noise[i] * NOISE_FACTOR)
        logit = logit + l
        contribs = contribs + c
    return logit / N_AUG, contribs / N_AUG


if __name__ == "__main__":
    n_bags = 2
    n_instances = 8
    n_features = 16
    n_hiddens = 16
    n_att_hiddens = 8

    key = jax.random.PRNGKey(0)
    k_x, k_noise, k_param = jax.random.split(key, 3)

    xs = jax.random.normal(k_x, (n_bags, n_instances, n_features), jnp.float32)
    # NOTE: PyTorch uses its own torch generator for the TTA noise; semantics are
    # identical, exact values differ, so noise is pre-sampled and passed in.
    noises = jax.random.normal(
        k_noise, (n_bags, N_AUG, n_instances, n_features), jnp.float32)
    params = init_params(k_param, n_features, n_hiddens, n_att_hiddens)

    # batched path: B bags in one pallas_call (parallel bag grid axis)
    logits, contribs = test_aug_attention_mil_batched(xs, noises, params)
    jax.block_until_ready((logits, contribs))

    for b in range(n_bags):
        ref_logit, ref_contrib = reference_forward(xs[b], noises[b], params)
        assert jnp.allclose(logits[b:b + 1], ref_logit, atol=1e-5, rtol=1e-5), (
            b, logits[b], ref_logit)
        assert jnp.allclose(contribs[b], ref_contrib, atol=1e-5, rtol=1e-5)

    # single-bag path (original module signature)
    logit0, contrib0 = test_aug_attention_mil(xs[0], noises[0], params)
    jax.block_until_ready((logit0, contrib0))
    ref_logit0, ref_contrib0 = reference_forward(xs[0], noises[0], params)
    assert jnp.allclose(logit0, ref_logit0, atol=1e-5, rtol=1e-5)
    assert jnp.allclose(contrib0, ref_contrib0, atol=1e-5, rtol=1e-5)

    print("KERNEL_OK")
</pallas_src>

<mosaic_0001>
module attributes {stable_mosaic.version = 11 : i64} {
  func.func @_mil_kernel(%arg0: i32, %arg1: memref<1x8x16xf32, #tpu.memory_space<vmem>>, %arg2: memref<1x5x8x16xf32, #tpu.memory_space<vmem>>, %arg3: memref<96x128xf32, #tpu.memory_space<vmem>>, %arg4: memref<1x16x1xf32, #tpu.memory_space<vmem>>) attributes {dimension_semantics = [#tpu.dimension_semantics<parallel>], iteration_bounds = array<i64: 2>, scalar_prefetch = 0 : i64, scratch_operands = 0 : i64, tpu.core_type = #tpu.core_type<tc>, window_params = [{transform_indices = @transform_0, window_bounds = array<i64: 1, 8, 16>}, {transform_indices = @transform_1, window_bounds = array<i64: 1, 5, 8, 16>}, {pipeline_mode = #tpu.pipeline_mode<synchronous>, transform_indices = @transform_2, window_bounds = array<i64: 96, 128>}, {transform_indices = @transform_3, window_bounds = array<i64: 1, 16, 1>}]} {
    %c0 = arith.constant 0 : index
    %c0_0 = arith.constant 0 : index
    %0 = vector.load %arg3[%c0, %c0_0] : memref<96x128xf32, #tpu.memory_space<vmem>>, vector<16x32xf32>
    %c16 = arith.constant 16 : index
    %c0_1 = arith.constant 0 : index
    %1 = vector.load %arg3[%c16, %c0_1] : memref<96x128xf32, #tpu.memory_space<vmem>>, vector<1x32xf32>
    %c24 = arith.constant 24 : index
    %c0_2 = arith.constant 0 : index
    %2 = vector.load %arg3[%c24, %c0_2] : memref<96x128xf32, #tpu.memory_space<vmem>>, vector<32x16xf32>
    %c56 = arith.constant 56 : index
    %c0_3 = arith.constant 0 : index
    %3 = vector.load %arg3[%c56, %c0_3] : memref<96x128xf32, #tpu.memory_space<vmem>>, vector<1x16xf32>
    %c64 = arith.constant 64 : index
    %c0_4 = arith.constant 0 : index
    %4 = vector.load %arg3[%c64, %c0_4] : memref<96x128xf32, #tpu.memory_space<vmem>>, vector<16x17xf32>
    %c80 = arith.constant 80 : index
    %c0_5 = arith.constant 0 : index
    %5 = vector.load %arg3[%c80, %c0_5] : memref<96x128xf32, #tpu.memory_space<vmem>>, vector<1x8xf32>
    %c88 = arith.constant 88 : index
    %c0_6 = arith.constant 0 : index
    %6 = vector.load %arg3[%c88, %c0_6] : memref<96x128xf32, #tpu.memory_space<vmem>>, vector<1x1xf32>
    %c0_7 = arith.constant 0 : index
    %c0_8 = arith.constant 0 : index
    %c0_9 = arith.constant 0 : index
    %7 = vector.load %arg1[%c0_7, %c0_8, %c0_9] : memref<1x8x16xf32, #tpu.memory_space<vmem>>, vector<1x8x16xf32>
    %8 = vector.shape_cast %7 : vector<1x8x16xf32> to vector<8x16xf32>
    %9 = vector.shape_cast %8 : vector<8x16xf32> to vector<1x8x16xf32>
    %c0_10 = arith.constant 0 : index
    %c0_11 = arith.constant 0 : index
    %c0_12 = arith.constant 0 : index
    %c0_13 = arith.constant 0 : index
    %10 = vector.load %arg2[%c0_10, %c0_11, %c0_12, %c0_13] : memref<1x5x8x16xf32, #tpu.memory_space<vmem>>, vector<1x5x8x16xf32>
    %11 = vector.shape_cast %10 : vector<1x5x8x16xf32> to vector<5x8x16xf32>
    %cst = arith.constant 1.000000e-01 : f32
    %12 = vector.broadcast %cst : f32 to vector<5x8x16xf32>
    %13 = arith.mulf %11, %12 : vector<5x8x16xf32>
    %14 = vector.broadcast %9 : vector<1x8x16xf32> to vector<5x8x16xf32>
    %15 = arith.addf %14, %13 : vector<5x8x16xf32>
    %16 = vector.shape_cast %15 : vector<5x8x16xf32> to vector<40x16xf32>
    %cst_14 = arith.constant dense<0.000000e+00> : vector<40x32xf32>
    %17 = tpu.matmul %16, %0, %cst_14 {dimension_numbers = #tpu.dot_dimension_numbers<[1], [0], [0], [1], [0, 0, 1, 1], [], []>} : vector<40x16xf32>, vector<16x32xf32>, vector<40x32xf32> -> vector<40x32xf32>
    %18 = vector.broadcast %1 : vector<1x32xf32> to vector<40x32xf32>
    %19 = arith.addf %17, %18 : vector<40x32xf32>
    %cst_15 = arith.constant 0.000000e+00 : f32
    %20 = vector.broadcast %cst_15 : f32 to vector<40x32xf32>
    %21 = arith.maximumf %19, %20 : vector<40x32xf32>
    %cst_16 = arith.constant dense<0.000000e+00> : vector<40x16xf32>
    %22 = tpu.matmul %21, %2, %cst_16 {dimension_numbers = #tpu.dot_dimension_numbers<[1], [0], [0], [1], [0, 0, 1, 1], [], []>} : vector<40x32xf32>, vector<32x16xf32>, vector<40x16xf32> -> vector<40x16xf32>
    %23 = vector.broadcast %3 : vector<1x16xf32> to vector<40x16xf32>
    %24 = arith.addf %22, %23 : vector<40x16xf32>
    %cst_17 = arith.constant 0.000000e+00 : f32
    %25 = vector.broadcast %cst_17 : f32 to vector<40x16xf32>
    %26 = arith.maximumf %24, %25 : vector<40x16xf32>
    %cst_18 = arith.constant dense<0.000000e+00> : vector<40x17xf32>
    %27 = tpu.matmul %26, %4, %cst_18 {dimension_numbers = #tpu.dot_dimension_numbers<[1], [0], [0], [1], [0, 0, 1, 1], [], []>} : vector<40x16xf32>, vector<16x17xf32>, vector<40x17xf32> -> vector<40x17xf32>
    %28 = vector.extract_strided_slice %27 {offsets = [0, 0], sizes = [40, 8], strides = [1, 1]} : vector<40x17xf32> to vector<40x8xf32>
    %29 = math.tanh %28 : vector<40x8xf32>
    %30 = vector.extract_strided_slice %27 {offsets = [0, 8], sizes = [40, 8], strides = [1, 1]} : vector<40x17xf32> to vector<40x8xf32>
    %31 = arith.negf %30 : vector<40x8xf32>
    %32 = math.exp %31 : vector<40x8xf32>
    %cst_19 = arith.constant 1.000000e+00 : f32
    %33 = vector.broadcast %cst_19 : f32 to vector<40x8xf32>
    %34 = arith.addf %33, %32 : vector<40x8xf32>
    %35 = arith.divf %33, %34 : vector<40x8xf32>
    %36 = arith.mulf %29, %35 : vector<40x8xf32>
    %37 = vector.extract_strided_slice %27 {offsets = [0, 16], sizes = [40, 1], strides = [1, 1]} : vector<40x17xf32> to vector<40x1xf32>
    %38 = vector.broadcast %5 : vector<1x8xf32> to vector<40x8xf32>
    %39 = arith.mulf %36, %38 : vector<40x8xf32>
    %cst_20 = arith.constant dense<0.000000e+00> : vector<40xf32>
    %40 = vector.multi_reduction <add>, %39, %cst_20 [1] : vector<40x8xf32> to vector<40xf32>
    %41 = vector.shape_cast %40 : vector<40xf32> to vector<40x1xf32>
    %42 = vector.shape_cast %41 : vector<40x1xf32> to vector<5x8x1xf32>
    %cst_21 = arith.constant dense<0xFF800000> : vector<5x1xf32>
    %43 = vector.multi_reduction <maximumf>, %42, %cst_21 [1] : vector<5x8x1xf32> to vector<5x1xf32>
    %44 = vector.shape_cast %43 : vector<5x1xf32> to vector<5x1x1xf32>
    %45 = vector.broadcast %44 : vector<5x1x1xf32> to vector<5x8x1xf32>
    %46 = arith.subf %42, %45 : vector<5x8x1xf32>
    %47 = math.exp %46 : vector<5x8x1xf32>
    %cst_22 = arith.constant dense<0.000000e+00> : vector<5x1xf32>
    %48 = vector.multi_reduction <add>, %47, %cst_22 [1] : vector<5x8x1xf32> to vector<5x1xf32>
    %49 = vector.shape_cast %48 : vector<5x1xf32> to vector<5x1x1xf32>
    %50 = tpu.reciprocal %49 {approx = true} : vector<5x1x1xf32> -> vector<5x1x1xf32>
    %51 = arith.mulf %49, %50 : vector<5x1x1xf32>
    %cst_23 = arith.constant 2.000000e+00 : f32
    %52 = vector.broadcast %cst_23 : f32 to vector<5x1x1xf32>
    %53 = arith.subf %52, %51 : vector<5x1x1xf32>
    %54 = arith.mulf %50, %53 : vector<5x1x1xf32>
    %55 = vector.broadcast %54 : vector<5x1x1xf32> to vector<5x8x1xf32>
    %56 = arith.mulf %47, %55 : vector<5x8x1xf32>
    %57 = vector.shape_cast %56 : vector<5x8x1xf32> to vector<40x1xf32>
    %58 = arith.mulf %57, %37 : vector<40x1xf32>
    %59 = vector.broadcast %6 : vector<1x1xf32> to vector<40x1xf32>
    %60 = arith.addf %58, %59 : vector<40x1xf32>
    %61 = vector.shape_cast %60 : vector<40x1xf32> to vector<5x8x1xf32>
    %cst_24 = arith.constant dense<0.000000e+00> : vector<8x1xf32>
    %62 = vector.multi_reduction <add>, %61, %cst_24 [0] : vector<5x8x1xf32> to vector<8x1xf32>
    %cst_25 = arith.constant 2.000000e-01 : f32
    %63 = vector.broadcast %cst_25 : f32 to vector<8x1xf32>
    %64 = arith.mulf %62, %63 : vector<8x1xf32>
    %cst_26 = arith.constant dense<0.000000e+00> : vector<1xf32>
    %65 = vector.multi_reduction <add>, %64, %cst_26 [0] : vector<8x1xf32> to vector<1xf32>
    %66 = vector.shape_cast %65 : vector<1xf32> to vector<1x1xf32>
    %cst_27 = arith.constant 7.000000e+00 : f32
    %67 = vector.broadcast %cst_27 : f32 to vector<1x1xf32>
    %68 = arith.mulf %67, %6 : vector<1x1xf32>
    %69 = arith.subf %66, %68 : vector<1x1xf32>
    %c0_28 = arith.constant 0 : index
    %c0_29 = arith.constant 0 : index
    %c0_30 = arith.constant 0 : index
    %70 = vector.load %arg4[%c0_28, %c0_29, %c0_30] : memref<1x16x1xf32, #tpu.memory_space<vmem>>, vector<1x8x1xf32>
    %71 = vector.shape_cast %70 : vector<1x8x1xf32> to vector<8x1xf32>
    %72 = vector.shape_cast %64 : vector<8x1xf32> to vector<1x8x1xf32>
    tpu.vector_store %arg4[%c0_28, %c0_29, %c0_30], %72 {strides = array<i32>} : memref<1x16x1xf32, #tpu.memory_space<vmem>>, vector<1x8x1xf32>,
    %73 = vector.shape_cast %69 : vector<1x1xf32> to vector<1x1xf32>
    %74 = vector.broadcast %73 : vector<1x1xf32> to vector<8x1xf32>
    %c0_31 = arith.constant 0 : index
    %c8 = arith.constant 8 : index
    %c0_32 = arith.constant 0 : index
    %75 = vector.load %arg4[%c0_31, %c8, %c0_32] : memref<1x16x1xf32, #tpu.memory_space<vmem>>, vector<1x8x1xf32>
    %76 = vector.shape_cast %75 : vector<1x8x1xf32> to vector<8x1xf32>
    %77 = vector.shape_cast %74 : vector<8x1xf32> to vector<1x8x1xf32>
    tpu.vector_store %arg4[%c0_31, %c8, %c0_32], %77 {strides = array<i32>} : memref<1x16x1xf32, #tpu.memory_space<vmem>>, vector<1x8x1xf32>,
    return
  }
  func.func @transform_0(%arg0: i32) -> (i32, i32, i32) {
    %c0_i32 = arith.constant 0 : i32
    %c0_i32_0 = arith.constant 0 : i32
    %c0_i32_1 = arith.constant 0 : i32
    return %arg0, %c0_i32, %c0_i32_0 : i32, i32, i32
  }
  func.func @transform_1(%arg0: i32) -> (i32, i32, i32, i32) {
    %c0_i32 = arith.constant 0 : i32
    %c0_i32_0 = arith.constant 0 : i32
    %c0_i32_1 = arith.constant 0 : i32
    %c0_i32_2 = arith.constant 0 : i32
    return %arg0, %c0_i32, %c0_i32_0, %c0_i32_1 : i32, i32, i32, i32
  }
  func.func @transform_2(%arg0: i32) -> (i32, i32) {
    %c0_i32 = arith.constant 0 : i32
    %c0_i32_0 = arith.constant 0 : i32
    %c0_i32_1 = arith.constant 0 : i32
    return %c0_i32, %c0_i32_0 : i32, i32
  }
  func.func @transform_3(%arg0: i32) -> (i32, i32, i32) {
    %c0_i32 = arith.constant 0 : i32
    %c0_i32_0 = arith.constant 0 : i32
    %c0_i32_1 = arith.constant 0 : i32
    return %arg0, %c0_i32, %c0_i32_0 : i32, i32, i32
  }
}

</mosaic_0001>

<bundles_post_ra>
// kernel: tpu_custom_call.1
= control target key start
LH: loop header
LB: loop body
LE: loop exit
PB: predicated region body
PF: predicated region fallthrough
CT: control target
= control target key end

     0   :  { %8 = vsyncpa [#allocation3], 0  ;;  %s1643_s0 = inlined_call_operand.hbm [shape: f32[2,8,16], index: 0, kind: input, shape index: {}]   ;;  %s1644_s1 = inlined_call_operand.hbm [shape: f32[2,5,8,16], index: 1, kind: input, shape index: {}]   ;;  %s1645_s2 = inlined_call_operand.hbm [shape: f32[96,128], index: 2, kind: input, shape index: {}]   ;;  %s1646_s3 = inlined_call_operand.vmem [shape: f32[2,16,1], index: 3, kind: output, shape index: {}]  }
   0x1   :  { %10 = vsyncpa [#allocation3 + $0x1], 0 }
   0x2   :  { %11 = vsyncpa [#allocation5], 0 }
   0x3   :  { %13 = vsyncpa [#allocation5 + $0x1], 0  ;;  %s1361_s12 = smov 0   ;;  %s1363_s13 = smov 0  }
   0x4   :  { %s1365_s14 = smov 0   ;;  %s1367_s15 = smov 0  }
   0x5 LB: > { %s1380_s16 = sadd.s32 4294967295, %s1328_s15   ;;  %p39_p0 = scmp.ne.s32.totalorder %s1320_s13, %s1316_s12  ;;  %s1328_s15 = sphi %s1367_s15, %s1661_s15   ;;  %s1324_s14 = sphi %s1365_s14, %s1660_s14   ;;  %s1320_s13 = sphi %s1363_s13, %s1659_s13   ;;  %s1316_s12 = sphi %s1361_s12, %s1658_s12  }
   0x6   : > { %p1647_p1 = scmp.eq.s32.totalorder %s1380_s16, 0  ;;  %p947_p2 = scmp.ge.s32.totalorder %s1328_s15, 1 }
   0x7   : > { %p123_p3 = scmp.lt.s32.totalorder %s1328_s15, 3  ;;  %s1330_s19 = smov [#allocation6]  }
   0x8   : > { %p1388_p4 = por %p1647_p1, %p39_p0  ;;  %s135_s20 = sshll.u32 %s1330_s19, 4  ;;  %s136_s20 = int_to_ptr.vmem [resolvable:$true] %s135_s20 }
   0x9   : > { %p1392_p5 = pnand %p947_p2, %p123_p3  ;;  %s1405_s22 = sadd.s32 1, %s1328_s15  }
   0xa   : > { %s1650_s17 = scalar_select %p1388_p4, 1, 0 }
   0xb   : > { %s1651_s18 = scalar_select %p1392_p5, 1, 0 }
   0xc   : > { %p1093_p6 = pneg %p1392_p5  ;;  %s26_s23 = sadd.s32 1, %s1324_s14 }
   0xd   : > { %s23_s24 = ssub.s32 %s1328_s15, %s1405_s22  ;;  %s1198_s27 = scalar_lea.hbm %s1645_s2, 1536 }
   0xe   : > { %p1400_p7 = pnand %p1093_p6, %p1647_p1  ;;  %p1199_p8 = scmp.ne.s32.totalorder %s1645_s2, %s1198_s27 }
   0xf   : > { %p1205_p12 = scmp.lt.u32.totalorder %s1198_s27, %s1645_s2 }
  0x10   : > { %p1200_p9 = pneg %p1400_p7 }
  0x12   : > { %p1201_p10 = pnand %p1200_p9, %p1199_p8 }
  0x14   : > { %p1202_p11 = pneg %p1201_p10 }
  0x16   : > { %p1207_p13 = pnand %p1205_p12, %p1202_p11 }
  0x18   : > { %1210 = shalt.err (!%p1207_p13)
}
  0x19   : > { %s1211_s5 = scalar_lea.vmem %s136_s20, 1536  ;;  %p1219_p6 = scmp.lt.s32.totalorder %s136_s20, %s136_s20 }
  0x1a   : > { %p1212_p0 = scmp.ne.s32.totalorder %s136_s20, %s1211_s5  ;;  %p1220_p1 = scmp.lt.s32.totalorder %s1211_s5, %s1211_s5 }
  0x1c   : > { %p1214_p2 = pnand %p1212_p0, %p1200_p9  ;;  %p1221_p4 = por %p1220_p1, %p1219_p6 }
  0x1e   : > { %p1215_p3 = pneg %p1214_p2 }
  0x20   : > { %p1222_p5 = pnand %p1221_p4, %p1215_p3 }
  0x22   : > { %1225 = shalt.err (!%p1222_p5)
}
  0x23   : > { %s1331_s6 = smov 128   ;;  %s1332_s7 = smov 8  }
  0x24   : > { %1096 = dma.hbm_to_vmem [thread:$0]  (!%p1400_p7), %s1645_s2, 1536, %s136_s20, [#allocation5], %s1331_s6, %s1331_s6, %s1332_s7  }
  0x25   : > { %p24_p1 = scmp.eq.s32.totalorder %s23_s24, 0  ;;  %p33_p4 = scmp.ne.s32.totalorder %s1324_s14, %s1320_s13 }
  0x26   : > { %p34_p5 = scmp.eq.s32.totalorder %s1328_s15, 0  ;;  %p1105_p8 = scmp.lt.s32.totalorder %s1328_s15, 2 }
  0x27   : > { %s1434_s10 = scalar_select %p24_p1, %s1324_s14, %s26_s23  }
  0x28   : > { %p35_p9 = por %p34_p5, %p33_p4  ;;  %s1437_s11 = sand.u32 1, %s1324_s14  }
  0x29   : > { %s950_s12 = sshll.u32 %s1437_s11, 3  ;;  %s951_s19 = sshll.u32 %s1328_s15, 7 }
  0x2a   : > { %s1444_s26 = scalar_lea.hbm %s1643_s0, %s951_s19  ;;  %s153_s20 = scalar_lea.vmem [#allocation2], %s950_s12 }
  0x2b   : > { %s160_s23 = sshll.u32 %s153_s20, 4  ;;  %p1448_p7 = pnand %p1105_p8, %p35_p9  ;;  %s1446_s23 = int_to_ptr.vmem [resolvable:$true] %s160_s23 }
  0x2c   : > { %s1082_s27 = smul.u32 40, %s1437_s11  ;;  %s167_s28 = sand.u32 1, %s1328_s15  }
  0x2d   : > { %s150_s29 = scalar_lea.sflag [#allocation3], %s1437_s11  ;;  %s1226_s30 = scalar_lea.hbm %s1444_s26, 128 }
  0x2e   : > { %p1227_p10 = scmp.ne.s32.totalorder %s1444_s26, %s1226_s30  ;;  %p1228_p11 = pneg %p1448_p7 }
  0x2f   : > { %s1231_s8 = scalar_lea.hbm %s1643_s0, 256  ;;  %p1232_p0 = scmp.lt.u32.totalorder %s1444_s26, %s1643_s0 }
  0x30   : > { %p1229_p12 = pnand %p1228_p11, %p1227_p10  ;;  %p1233_p2 = scmp.lt.u32.totalorder %s1231_s8, %s1226_s30 }
  0x31   : > { %p1235_p6 = scmp.lt.u32.totalorder %s1226_s30, %s1444_s26 }
  0x32   : > { %p1230_p13 = pneg %p1229_p12  ;;  %p1234_p3 = por %p1233_p2, %p1232_p0 }
  0x34   : > { %p1236_p1 = por %p1235_p6, %p1234_p3 }
  0x36   : > { %p1237_p4 = pnand %p1236_p1, %p1230_p13 }
  0x38   : > { %1240 = shalt.err (!%p1237_p4)
}
  0x39   : > { %s1241_s19 = scalar_lea.vmem %s1446_s23, 128  ;;  %s1333_s21 = smov [#allocation2]  }
  0x3a   : > { %p1242_p5 = scmp.ne.s32.totalorder %s1446_s23, %s1241_s19  ;;  %s1246_s25 = sshll.u32 %s1333_s21, 4  ;;  %s1247_s25 = int_to_ptr.vmem [resolvable:$false] %s1246_s25 }
  0x3b   : > { %s1248_s20 = scalar_lea.vmem %s1247_s25, 256  ;;  %p1249_p10 = scmp.lt.s32.totalorder %s1446_s23, %s1247_s25 }
  0x3c   : > { %p1244_p8 = pnand %p1242_p5, %p1228_p11  ;;  %p1250_p12 = scmp.lt.s32.totalorder %s1248_s20, %s1241_s19 }
  0x3e   : > { %p1245_p9 = pneg %p1244_p8  ;;  %p1251_p0 = por %p1250_p12, %p1249_p10 }
  0x40   : > { %p1252_p2 = pnand %p1251_p0, %p1245_p9 }
  0x42   : > { %1255 = shalt.err (!%p1252_p2)
}
  0x43   : > { %1100 = dma.hbm_to_vmem [thread:$0]  (!%p1448_p7), %s1444_s26, 128, %s1446_s23, %s150_s29  }
  0x44   : > { %s1083_s30 = smul.u32 640, %s1328_s15  ;;  %s171_s4 = scalar_lea.vmem [#allocation4], %s1082_s27 }
  0x45   : > { %s178_s5 = sshll.u32 %s171_s4, 4  ;;  %s1492_s19 = scalar_lea.sflag [#allocation5], %s167_s28  ;;  %s1483_s5 = int_to_ptr.vmem [resolvable:$true] %s178_s5 }
  0x46   : > { %s1488_s12 = scalar_lea.hbm %s1644_s1, %s1083_s30  ;;  %s1261_s23 = scalar_lea.hbm %s1644_s1, 1280 }
  0x47   : > { %s1256_s21 = scalar_lea.hbm %s1488_s12, 640  ;;  %p1262_p1 = scmp.lt.u32.totalorder %s1488_s12, %s1644_s1 }
  0x48   : > { %p1257_p13 = scmp.ne.s32.totalorder %s1488_s12, %s1256_s21  ;;  %p1263_p4 = scmp.lt.u32.totalorder %s1261_s23, %s1256_s21 }
  0x49   : > { %p1265_p8 = scmp.lt.u32.totalorder %s1256_s21, %s1488_s12 }
  0x4a   : > { %p1259_p3 = pnand %p1257_p13, %p1228_p11  ;;  %p1264_p5 = por %p1263_p4, %p1262_p1 }
  0x4c   : > { %p1260_p6 = pneg %p1259_p3  ;;  %p1266_p9 = por %p1265_p8, %p1264_p5 }
  0x4e   : > { %p1267_p10 = pnand %p1266_p9, %p1260_p6 }
  0x50   : > { %1270 = shalt.err (!%p1267_p10)
}
  0x51   : > { %s1271_s15 = scalar_lea.vmem %s1483_s5, 640  ;;  %s1334_s28 = smov [#allocation4]  }
  0x52   : > { %p1272_p12 = scmp.ne.s32.totalorder %s1483_s5, %s1271_s15  ;;  %s1276_s25 = sshll.u32 %s1334_s28, 4  ;;  %s1277_s25 = int_to_ptr.vmem [resolvable:$false] %s1276_s25 }
  0x53   : > { %s1278_s20 = scalar_lea.vmem %s1277_s25, 1280  ;;  %p1279_p13 = scmp.lt.s32.totalorder %s1483_s5, %s1277_s25 }
  0x54   : > { %p1274_p0 = pnand %p1272_p12, %p1228_p11  ;;  %p1280_p3 = scmp.lt.s32.totalorder %s1278_s20, %s1271_s15 }
  0x56   : > { %p1275_p2 = pneg %p1274_p0  ;;  %p1281_p1 = por %p1280_p3, %p1279_p13 }
  0x58   : > { %p1282_p4 = pnand %p1281_p1, %p1275_p2 }
  0x5a   : > { %1285 = shalt.err (!%p1282_p4)
}
  0x5b   : > { %1103 = dma.hbm_to_vmem [thread:$0]  (!%p1448_p7), %s1488_s12, 640, %s1483_s5, %s1492_s19, %s1331_s6, %s1331_s6, %s1332_s7  }
  0x5c   : > { %p1654_p11 = scmp.ne.s32.totalorder %s1651_s18, 0 }
  0x5d   : > { %s192_s30 = sand.u32 (!%p1654_p11), 1, %s1320_s13   ;;  %p1655_p6 = scmp.ne.s32.totalorder (!%p1654_p11), %s1650_s17, 0 }
  0x5e   : > { %190 = sbr.rel (%p1654_p11) target bundleno = 1264 (0x4f0), region = 32  ;;  %s954_s4 = sshll.u32 (!%p1654_p11), %s192_s30, 3 }
  0x5f   : > { %s193_s8 = scalar_lea.sflag (!%p1654_p11), [#allocation3], %s192_s30  ;;  %s196_s9 = scalar_lea.vmem (!%p1654_p11), [#allocation2], %s954_s4 }
  0x65   : > { %1303 = dma.done.wait (%p1655_p6), %s193_s8, 128  }
  0x66   : > { %1305 = vsyncadd (%p1655_p6), %s193_s8, 4294967168  ;;  %s201_s24 = sand.u32 1, %s1380_s16   ;;  %s1084_s21 = smul.u32 40, %s192_s30 }
  0x67   : > { %s202_s11 = scalar_lea.sflag [#allocation5], %s201_s24 }
  0x68   : > { %s205_s6 = scalar_lea.vmem [#allocation4], %s1084_s21 }
  0x69   : > { %1307 = dma.done.wait (%p1655_p6), %s202_s11, 640  }
  0x6a   : > { %1309 = vsyncadd (%p1655_p6), %s202_s11, 4294966656  ;;  %p1656_p7 = scmp.eq.s32.totalorder %s1380_s16, 0 }
  0x6c   : > { %1311 = dma.done.wait (%p1656_p7), [#allocation5], 1536   ;;  %p1657_p5 = pmov %p1656_p7 }
  0x6d   : > { %v1335_v0 = vmov 0.0|0.0   ;;  %vm1336_vm0 = vmmov 0   ;;  %v1337_v1 = vmov 0.0   ;;  %v242_v2 = vld [vmem:[#allocation6] sm:$0xff]  ;;  %v243_v3 = vld [vmem:[#allocation6 + $0x8] sm:$0xff]  ;;  %v255_v6 = vld [vmem:[%s205_s6] sm:$0xff] }
  0x6e   : > { %1313 = vsyncadd (%p1657_p5), [#allocation5], 4294965760  ;;  %1068 = vmatprep.subr.bf16.mxu0 %v1335_v0  ;;  %1011 = vmatprep.mubr.msk.f32.mxu0 %vm1336_vm0, %v1337_v1  ;;  %v1069_v4 = vpack.c.bf16 %v243_v3, %v242_v2  ;;  %v254_v5 = vld [vmem:[%s196_s9] sm:$0xff]  ;;  %v256_v7 = vld [vmem:[%s205_s6 + $0x8] sm:$0xff]  ;;  %v260_v8 = vmul.f32 0.1, %v255_v6 }
  0x6f   : > { %1080 = vmatprep.subr.bf16.mxu1 %v1335_v0  ;;  %1020 = vmatprep.mubr.msk.f32.mxu1 %vm1336_vm0, %v1337_v1  ;;  %v261_v9 = vmul.f32 0.1, %v256_v7  ;;  %v257_v10 = vld [vmem:[%s205_s6 + $0x10] sm:$0xff]  ;;  %vm274_vm1 = vcmask 130048   ;;  %v258_v11 = vld [vmem:[%s205_s6 + $0x18] sm:$0xff]  ;;  %v259_v12 = vld [vmem:[%s205_s6 + $0x20] sm:$0xff] }
  0x70   : > { %1070 = vmatpush3.bf16.msra.mxu0 %v1069_v4  ;;  %1081 = vmatpush3.bf16.msra.mxu1 %v1069_v4  ;;  %v245_v13 = vld [vmem:[#allocation6 + $0x18] sm:$0xff]  ;;  %v265_v14 = vadd.f32 %v260_v8, %v254_v5  ;;  %v263_v15 = vmul.f32 0.1, %v258_v11  ;;  %v246_v16 = vld [vmem:[#allocation6 + $0x20] sm:$0xff]  ;;  %v264_v17 = vmul.f32 0.1, %v259_v12 }
  0x71   : > { %1071 = vmatprep.subr.bf16.mxu1 %v1335_v0  ;;  %1077 = vmatprep.subr.bf16.mxu0 %v1335_v0  ;;  %v1072_v18 = vpack.c.bf16 %v246_v16, %v245_v13  ;;  %v266_v19 = vadd.f32 %v261_v9, %v254_v5  ;;  %v262_v20 = vmul.f32 0.1, %v257_v10  ;;  %v247_v24 = vld [vmem:[#allocation6 + $0x28] sm:$0xff]  ;;  %v248_v25 = vld [vmem:[#allocation6 + $0x30] sm:$0xff]  ;;  %v250_v27 = vld [vmem:[#allocation6 + $0x40] sm:$0xff]  ;;  %vm389_vm2 = vcmask 261120  }
  0x72   : > { %v268_v21 = vadd.f32 %v263_v15, %v254_v5  ;;  %v269_v22 = vadd.f32 %v264_v17, %v254_v5  ;;  %v1075_v26 = vpack.c.bf16 %v248_v25, %v247_v24  ;;  %v251_v28 = vld [vmem:[#allocation6 + $0x48] sm:$0xff]  ;;  %v958_v30 = vld [vmem:[#allocation6 + $0x10] ss:$0 sm:$0xff]  ;;  %v964_v51 = vld [vmem:[#allocation6 + $0x38] ss:$0 sm:$0xff]  ;;  %s1338_s17 = smov 120  }
  0x73   : > { %1012 = vmatmul.mubr.msk.f32.vlgmr.msra.gmra.mrb[0].mxu0 %vm274_vm1, %v265_v14  ;;  %v267_v23 = vadd.f32 %v262_v20, %v254_v5  ;;  %v1078_v29 = vpack.c.bf16 %v251_v28, %v250_v27  ;;  %vm674_vm3 = vcmask 64512   ;;  %s1339_s18 = smov 16   ;;  %vm808_vm4 = vcmask 138368   ;;  %s1340_s7 = smov 112  }
  0x74   : > { %1014 = vmatprep.mubr.msk.f32.mxu0 %vm1336_vm0, %v1337_v1  ;;  %1021 = vmatmul.mubr.msk.f32.vlgmr.msra.gmra.mrb[0].mxu1 %vm274_vm1, %v268_v21  ;;  %p237_p8 = scmp.lt.s32.totalorder %s1380_s16, 1  ;;  %vm836_vm5 = vcmask 7168  }
  0x75   : > { %1023 = vmatprep.mubr.msk.f32.mxu1 %vm1336_vm0, %v1337_v1  ;;  %1073 = vmatpush3.bf16.msra.mxu1 %v1072_v18 }
  0x76   : > { %1074 = vmatprep.subr.bf16.mxu1 %v1335_v0  ;;  %1079 = vmatpush3.bf16.msra.mxu0 %v1078_v29  ;;  %s1663_s16 = smov (!%p237_p8, %s1380_s16), 1 }
  0x77   : > { %1015 = vmatmul.mubr.msk.f32.gmra.mrb[2].mxu0 %vm274_vm1, %v266_v19  ;;  %s983_s5 = sshll.u32 %s1663_s16, 4 }
  0x78   : > { %1017 = vmatprep.mubr.msk.f32.mxu0 %vm1336_vm0, %v1337_v1  ;;  %1024 = vmatmul.mubr.msk.f32.gmra.mrb[2].mxu1 %vm274_vm1, %v269_v22  ;;  %s241_s26 = scalar_lea.vmem %s1646_s3, %s983_s5 }
  0x79   : > { %1034 = vmatprep.mubr.msk.f32.mxu1 %vm1336_vm0, %v1337_v1  ;;  %1076 = vmatpush3.bf16.msra.mxu1 %v1075_v26 }
  0x7b   : > { %1018 = vmatmul.mubr.msk.f32.gmra.mrb[4].mxu0 %vm274_vm1, %v267_v23 }
  0x7c   : > { %1053 = vmatprep.mubr.msk.f32.mxu0 %vm1336_vm0, %v1337_v1 }
 0x146   : > { %v356_v31 = vpop.f32.mrb[0].mxu0 }
 0x147   : > { %v357_v32 = vadd.f32 %v958_v30, %v356_v31  ;;  %v1013_v33 = vpop.f32.mrb[1].mxu0  ;;  %v371_v34 = vpop.f32.mrb[0].mxu1 }
 0x148   : > { %v1022_v36 = vpop.f32.mrb[1].mxu1  ;;  %v372_v46 = vadd.f32 %v958_v30, %v371_v34 }
 0x149   : > { %v380_v35 = vmax.f32 %v357_v32, 0.0 }
 0x14a   : > { %v361_v37 = vpop.f32.mrb[2].mxu0  ;;  %v383_v48 = vmax.f32 %v372_v46, 0.0 }
 0x14b   : > { %v362_v38 = vadd.f32 %v958_v30, %v361_v37  ;;  %v1016_v39 = vpop.f32.mrb[3].mxu0  ;;  %1035 = vmatmul.mubr.msk.f32.vlgmr.msra.gmra.mrb[4].mxu1 %vm389_vm2, %v380_v35  ;;  %v376_v40 = vpop.f32.mrb[2].mxu1 }
 0x14c   : > { %1037 = vmatprep.mubr.msk.f32.mxu1 %vm1336_vm0, %v1337_v1  ;;  %v1025_v42 = vpop.f32.mrb[3].mxu1  ;;  %v377_v49 = vadd.f32 %v958_v30, %v376_v40  ;;  %v980_v40 = vld [vmem:[#allocation6 + $0x50] ss:$0 sm:$0xff] }
 0x14d   : > { %v381_v41 = vmax.f32 %v362_v38, 0.0 }
 0x14e   : > { %v366_v43 = vpop.f32.mrb[4].mxu0  ;;  %v384_v50 = vmax.f32 %v377_v49, 0.0 }
 0x14f   : > { %v367_v44 = vadd.f32 %v958_v30, %v366_v43  ;;  %v1019_v45 = vpop.f32.mrb[5].mxu0  ;;  %1038 = vmatmul.mubr.msk.f32.gmra.mrb[6].mxu1 %vm389_vm2, %v381_v41 }
 0x150   : > { %1040 = vmatprep.mubr.msk.f32.mxu1 %vm1336_vm0, %v1337_v1 }
 0x151   : > { %v382_v47 = vmax.f32 %v367_v44, 0.0 }
 0x153   : > { %1041 = vmatmul.mubr.msk.f32.gmra.mrb[8].mxu1 %vm389_vm2, %v382_v47 }
 0x154   : > { %1043 = vmatprep.mubr.msk.f32.mxu1 %vm1336_vm0, %v1337_v1 }
 0x157   : > { %1044 = vmatmul.mubr.msk.f32.gmra.mrb[10].mxu1 %vm389_vm2, %v383_v48 }
 0x158   : > { %1046 = vmatprep.mubr.msk.f32.mxu1 %vm1336_vm0, %v1337_v1 }
 0x15b   : > { %1047 = vmatmul.mubr.msk.f32.gmra.mrb[12].mxu1 %vm389_vm2, %v384_v50 }
 0x21e   : > { %v471_v52 = vpop.f32.mrb[4].mxu1 }
 0x21f   : > { %v472_v53 = vadd.f32 %v964_v51, %v471_v52  ;;  %v1036_v54 = vpop.f32.mrb[5].mxu1 }
 0x221   : > { %v495_v55 = vmax.f32 %v472_v53, 0.0 }
 0x222   : > { %v476_v56 = vpop.f32.mrb[6].mxu1 }
 0x223   : > { %v477_v57 = vadd.f32 %v964_v51, %v476_v56  ;;  %v1039_v58 = vpop.f32.mrb[7].mxu1  ;;  %1054 = vmatmul.mubr.msk.f32.vlgmr.msra.gmra.mrb[6].mxu0 %vm274_vm1, %v495_v55 }
 0x224   : > { %1056 = vmatprep.mubr.msk.f32.mxu0 %vm1336_vm0, %v1337_v1 }
 0x225   : > { %v496_v59 = vmax.f32 %v477_v57, 0.0 }
 0x226   : > { %v481_v60 = vpop.f32.mrb[8].mxu1 }
 0x227   : > { %v482_v61 = vadd.f32 %v964_v51, %v481_v60  ;;  %v1042_v62 = vpop.f32.mrb[9].mxu1  ;;  %1057 = vmatmul.mubr.msk.f32.gmra.mrb[8].mxu0 %vm274_vm1, %v496_v59 }
 0x228   : > { %1059 = vmatprep.mubr.msk.f32.mxu0 %vm1336_vm0, %v1337_v1 }
 0x229   : > { %v497_v63 = vmax.f32 %v482_v61, 0.0 }
 0x22a   : > { %v486_v0 = vpop.f32.mrb[10].mxu1 }
 0x22b   : > { %v487_v2 = vadd.f32 %v964_v51, %v486_v0  ;;  %v1045_v3 = vpop.f32.mrb[11].mxu1  ;;  %1060 = vmatmul.mubr.msk.f32.gmra.mrb[10].mxu0 %vm274_vm1, %v497_v63  ;;  %v795_v63 = vlaneseq }
 0x22c   : > { %1062 = vmatprep.mubr.msk.f32.mxu0 %vm1336_vm0, %v1337_v1 }
 0x22d   : > { %v498_v4 = vmax.f32 %v487_v2, 0.0  ;;  %v1607_v2 = vshrl.u32 %v795_v63, 7 }
 0x22e   : > { %v491_v5 = vpop.f32.mrb[12].mxu1 }
 0x22f   : > { %v492_v6 = vadd.f32 %v964_v51, %v491_v5  ;;  %v1048_v7 = vpop.f32.mrb[13].mxu1  ;;  %1063 = vmatmul.mubr.msk.f32.gmra.mrb[12].mxu0 %vm274_vm1, %v498_v4  ;;  %v797_v3 = vsub.s32 0, %v1607_v2  ;;  %v253_v4 = vld [vmem:[#allocation6 + $0x58] sm:$0x1] }
 0x230   : > { %1065 = vmatprep.mubr.msk.f32.mxu0 %vm1336_vm0, %v1337_v1 }
 0x231   : > { %v499_v8 = vmax.f32 %v492_v6, 0.0  ;;  %v798_v5 = vrot.slane %v253_v4, %v797_v3  ;;  %v826_v6 = vmul.f32 7.0, %v253_v4 }
 0x233   : > { %1066 = vmatmul.mubr.msk.f32.gmra.mrb[14].mxu0 %vm274_vm1, %v499_v8 }
 0x2f6   : > { %v1582_v9 = vpop.f32.mrb[6].mxu0 }
 0x2f7   : > { %v975_v10 = vmul.f32 -1.442695, %v1582_v9  ;;  %v1055_v11 = vpop.f32.mrb[7].mxu0 }
 0x2f9   : > { %1148 = vpow2.f32 %v975_v10 }
 0x2fa   : > { %v1585_v12 = vpop.f32.mrb[8].mxu0 }
 0x2fb   : > { %v976_v13 = vmul.f32 -1.442695, %v1585_v12  ;;  %v1058_v14 = vpop.f32.mrb[9].mxu0 }
 0x2fd   : > { %1150 = vpow2.f32 %v976_v13 }
 0x2fe   : > { %v1588_v15 = vpop.f32.mrb[10].mxu0 }
 0x2ff   : > { %v977_v16 = vmul.f32 -1.442695, %v1588_v15  ;;  %v1061_v1 = vpop.f32.mrb[11].mxu0 }
 0x301   : > { %1152 = vpow2.f32 %v977_v16 }
 0x302   : > { %v1591_v17 = vpop.f32.mrb[12].mxu0 }
 0x303   : > { %v1149_v18 = vpop.eup %1148  ;;  %v978_v19 = vmul.f32 -1.442695, %v1591_v17  ;;  %v1064_v20 = vpop.f32.mrb[13].mxu0 }
 0x304   : > { %v625_v21 = vadd.f32 1.0, %v1149_v18 }
 0x305   : > { %1154 = vpow2.f32 %v978_v19 }
 0x306   : > { %1156 = vrcp.f32 %v625_v21  ;;  %v1594_v22 = vpop.f32.mrb[14].mxu0 }
 0x307   : > { %v1151_v23 = vpop.eup %1150  ;;  %v979_v24 = vmul.f32 -1.442695, %v1594_v22  ;;  %v1067_v25 = vpop.f32.mrb[15].mxu0 }
 0x308   : > { %v626_v26 = vadd.f32 1.0, %v1151_v23 }
 0x309   : > { %1158 = vpow2.f32 %v979_v24 }
 0x30a   : > { %1160 = vrcp.f32 %v626_v26 }
 0x30b   : > { %v1153_v27 = vpop.eup %1152 }
 0x30c   : > { %v627_v28 = vadd.f32 1.0, %v1153_v27 }
 0x30e   : > { %1162 = vrcp.f32 %v627_v28 }
 0x30f   : > { %v1155_v29 = vpop.eup %1154 }
 0x310   : > { %v1157_v30 = vpop.eup %1156  ;;  %v628_v31 = vadd.f32 1.0, %v1155_v29 }
 0x311   : > { %645 = vrot.lane.b32.xlu0 %v1157_v30, %s1338_s17 }
 0x312   : > { %1164 = vrcp.f32 %v628_v31 }
 0x313   : > { %v1159_v32 = vpop.eup %1158 }
 0x314   : > { %v1161_v33 = vpop.eup %1160  ;;  %v629_v34 = vadd.f32 1.0, %v1159_v32 }
 0x315   : > { %647 = vrot.lane.b32.xlu0 %v1161_v33, %s1338_s17 }
 0x316   : > { %1166 = vrcp.f32 %v629_v34 }
 0x317   : > { %1168 = vtanh.f32 %v1582_v9 }
 0x318   : > { %v1163_v35 = vpop.eup %1162  ;;  %1170 = vtanh.f32 %v1585_v12 }
 0x319   : > { %649 = vrot.lane.b32.xlu1 %v1163_v35, %s1338_s17  ;;  %1172 = vtanh.f32 %v1588_v15 }
 0x31a   : > { %1174 = vtanh.f32 %v1591_v17 }
 0x31b   : > { %1176 = vtanh.f32 %v1594_v22 }
 0x31c   : > { %v1165_v36 = vpop.eup %1164 }
 0x31d   : > { %651 = vrot.lane.b32.xlu1 %v1165_v36, %s1338_s17 }
 0x320   : > { %v1167_v37 = vpop.eup %1166 }
 0x321   : > { %653 = vrot.lane.b32.xlu0 %v1167_v37, %s1338_s17  ;;  %v1169_v38 = vpop.eup %1168 }
 0x322   : > { %v1171_v43 = vpop.eup %1170 }
 0x323   : > { %v1173_v48 = vpop.eup %1172 }
 0x324   : > { %v1175_v53 = vpop.eup %1174 }
 0x325   : > { %v1177_v58 = vpop.eup %1176 }
 0x383   : > { %v646_v39 = vpop.permute.xlu0 %645 }
 0x384   : > { %v660_v41 = vmul.f32 %v1169_v38, %v646_v39 }
 0x386   : > { %v669_v42 = vmul.f32 %v980_v40, %v660_v41 }
 0x387   : > { %v648_v44 = vpop.permute.xlu0 %647 }
 0x388   : > { %v661_v45 = vmul.f32 %v1171_v43, %v648_v44  ;;  %v675_v46 = vsel %vm674_vm3, %v669_v42, 0.0 }
 0x389   : > { %676 = vadd.xlane.f32.xlu1 %v675_v46 }
 0x38a   : > { %v670_v47 = vmul.f32 %v980_v40, %v661_v45 }
 0x38b   : > { %v650_v49 = vpop.permute.xlu1 %649 }
 0x38c   : > { %v662_v50 = vmul.f32 %v1173_v48, %v650_v49  ;;  %v678_v51 = vsel %vm674_vm3, %v670_v47, 0.0 }
 0x38d   : > { %679 = vadd.xlane.f32.xlu0 %v678_v51 }
 0x38e   : > { %v671_v52 = vmul.f32 %v980_v40, %v662_v50 }
 0x38f   : > { %v652_v54 = vpop.permute.xlu1 %651 }
 0x390   : > { %v663_v55 = vmul.f32 %v1175_v53, %v652_v54  ;;  %v681_v56 = vsel %vm674_vm3, %v671_v52, 0.0 }
 0x391   : > { %682 = vadd.xlane.f32.xlu0 %v681_v56 }
 0x392   : > { %v672_v57 = vmul.f32 %v980_v40, %v663_v55 }
 0x393   : > { %v654_v59 = vpop.permute.xlu0 %653 }
 0x394   : > { %v664_v60 = vmul.f32 %v1177_v58, %v654_v59  ;;  %v684_v61 = vsel %vm674_vm3, %v672_v57, 0.0 }
 0x395   : > { %685 = vadd.xlane.f32.xlu1 %v684_v61 }
 0x396   : > { %v673_v62 = vmul.f32 %v980_v40, %v664_v60 }
 0x398   : > { %v687_v0 = vsel %vm674_vm3, %v673_v62, 0.0 }
 0x399   : > { %688 = vadd.xlane.f32.xlu0 %v687_v0 }
 0x3a6   : > { %800 = vrot.lane.b32.xlu1 %v798_v5, %s1339_s18 }
 0x3af   : > { %828 = vrot.lane.b32.xlu0 %v826_v6, %s1339_s18 }
 0x416   : > { %v677_v7 = vpop.xlane.xlu1 %676 }
 0x417   : > { %v690_v8 = vrot.slane %v677_v7, 4 }
 0x419   : > { %v691_v10 = vmax.f32 %v677_v7, %v690_v8 }
 0x41a   : > { %v680_v11 = vpop.xlane.xlu0 %679 }
 0x41b   : > { %v692_v13 = vrot.slane %v691_v10, 2  ;;  %v696_v14 = vrot.slane %v680_v11, 4 }
 0x41d   : > { %v693_v16 = vmax.f32 %v691_v10, %v692_v13  ;;  %v697_v1 = vmax.f32 %v680_v11, %v696_v14 }
 0x41e   : > { %v683_v18 = vpop.xlane.xlu0 %682 }
 0x41f   : > { %v694_v19 = vrot.slane %v693_v16, 1  ;;  %v698_v20 = vrot.slane %v697_v1, 2  ;;  %v702_v21 = vrot.slane %v683_v18, 4 }
 0x421   : > { %v695_v23 = vmax.f32 %v693_v16, %v694_v19  ;;  %v699_v24 = vmax.f32 %v697_v1, %v698_v20  ;;  %v703_v25 = vmax.f32 %v683_v18, %v702_v21 }
 0x422   : > { %v686_v26 = vpop.xlane.xlu1 %685 }
 0x423   : > { %v720_v27 = vsub.f32 %v677_v7, %v695_v23  ;;  %v700_v28 = vrot.slane %v699_v24, 1  ;;  %v704_v29 = vrot.slane %v703_v25, 2  ;;  %v708_v30 = vrot.slane %v686_v26, 4 }
 0x425   : > { %v725_v31 = vmul.f32 1.442695, %v720_v27  ;;  %v701_v32 = vmax.f32 %v699_v24, %v700_v28  ;;  %v705_v33 = vmax.f32 %v703_v25, %v704_v29  ;;  %v709_v34 = vmax.f32 %v686_v26, %v708_v30 }
 0x426   : > { %v689_v35 = vpop.xlane.xlu0 %688 }
 0x427   : > { %1178 = vpow2.f32 %v725_v31  ;;  %v721_v36 = vsub.f32 %v680_v11, %v701_v32  ;;  %v706_v37 = vrot.slane %v705_v33, 1  ;;  %v710_v38 = vrot.slane %v709_v34, 2 }
 0x428   : > { %v714_v39 = vrot.slane %v689_v35, 4 }
 0x429   : > { %v727_v40 = vmul.f32 1.442695, %v721_v36  ;;  %v707_v41 = vmax.f32 %v705_v33, %v706_v37  ;;  %v711_v42 = vmax.f32 %v709_v34, %v710_v38 }
 0x42a   : > { %v715_v43 = vmax.f32 %v689_v35, %v714_v39 }
 0x42b   : > { %1180 = vpow2.f32 %v727_v40  ;;  %v722_v44 = vsub.f32 %v683_v18, %v707_v41  ;;  %v712_v45 = vrot.slane %v711_v42, 1 }
 0x42c   : > { %v716_v46 = vrot.slane %v715_v43, 2 }
 0x42d   : > { %v729_v47 = vmul.f32 1.442695, %v722_v44  ;;  %v713_v48 = vmax.f32 %v711_v42, %v712_v45 }
 0x42e   : > { %v717_v49 = vmax.f32 %v715_v43, %v716_v46  ;;  %v801_v46 = vpop.permute.xlu1 %800 }
 0x42f   : > { %1182 = vpow2.f32 %v729_v47  ;;  %v723_v50 = vsub.f32 %v686_v26, %v713_v48 }
 0x430   : > { %v718_v51 = vrot.slane %v717_v49, 1 }
 0x431   : > { %v1179_v52 = vpop.eup %1178  ;;  %v731_v53 = vmul.f32 1.442695, %v723_v50 }
 0x432   : > { %v719_v54 = vmax.f32 %v717_v49, %v718_v51  ;;  %v735_v55 = vrot.slane %v1179_v52, 4 }
 0x433   : > { %1184 = vpow2.f32 %v731_v53 }
 0x434   : > { %v724_v56 = vsub.f32 %v689_v35, %v719_v54  ;;  %v736_v57 = vadd.f32 %v1179_v52, %v735_v55 }
 0x435   : > { %v1181_v58 = vpop.eup %1180 }
 0x436   : > { %v733_v59 = vmul.f32 1.442695, %v724_v56  ;;  %v737_v60 = vrot.slane %v736_v57, 2  ;;  %v741_v61 = vrot.slane %v1181_v58, 4 }
 0x438   : > { %1186 = vpow2.f32 %v733_v59  ;;  %v738_v62 = vadd.f32 %v737_v60, %v736_v57  ;;  %v742_v63 = vadd.f32 %v1181_v58, %v741_v61 }
 0x439   : > { %v1183_v0 = vpop.eup %1182 }
 0x43a   : > { %v739_v4 = vrot.slane %v738_v62, 1  ;;  %v743_v5 = vrot.slane %v742_v63, 2  ;;  %v747_v6 = vrot.slane %v1183_v0, 4 }
 0x43c   : > { %v740_v7 = vadd.f32 %v739_v4, %v738_v62  ;;  %v744_v8 = vadd.f32 %v743_v5, %v742_v63  ;;  %v748_v10 = vadd.f32 %v1183_v0, %v747_v6 }
 0x43d   : > { %v1185_v11 = vpop.eup %1184 }
 0x43e   : > { %v753_v13 = vrot.slane %v1185_v11, 4  ;;  %1188 = vrcp.f32 %v740_v7  ;;  %v745_v14 = vrot.slane %v744_v8, 1  ;;  %v749_v16 = vrot.slane %v748_v10, 2 }
 0x440   : > { %v754_v1 = vadd.f32 %v1185_v11, %v753_v13  ;;  %v746_v18 = vadd.f32 %v745_v14, %v744_v8  ;;  %v750_v19 = vadd.f32 %v749_v16, %v748_v10 }
 0x442   : > { %v1187_v20 = vpop.eup %1186  ;;  %v755_v21 = vrot.slane %v754_v1, 2  ;;  %v751_v23 = vrot.slane %v750_v19, 1  ;;  %1190 = vrcp.f32 %v746_v18 }
 0x443   : > { %v759_v24 = vrot.slane %v1187_v20, 4 }
 0x444   : > { %v756_v25 = vadd.f32 %v755_v21, %v754_v1  ;;  %v752_v26 = vadd.f32 %v751_v23, %v750_v19 }
 0x445   : > { %v760_v27 = vadd.f32 %v1187_v20, %v759_v24 }
 0x446   : > { %v757_v28 = vrot.slane %v756_v25, 1  ;;  %1192 = vrcp.f32 %v752_v26 }
 0x447   : > { %v761_v29 = vrot.slane %v760_v27, 2 }
 0x448   : > { %v1189_v30 = vpop.eup %1188  ;;  %v758_v31 = vadd.f32 %v757_v28, %v756_v25  ;;  %v829_v25 = vpop.permute.xlu0 %828 }
 0x449   : > { %v770_v32 = vmul.f32 %v1189_v30, %v740_v7  ;;  %v762_v33 = vadd.f32 %v761_v29, %v760_v27 }
 0x44a   : > { %1194 = vrcp.f32 %v758_v31 }
 0x44b   : > { %v775_v34 = vsub.f32 2.0, %v770_v32  ;;  %v763_v35 = vrot.slane %v762_v33, 1 }
 0x44c   : > { %v1191_v36 = vpop.eup %1190 }
 0x44d   : > { %v780_v37 = vmul.f32 %v1189_v30, %v775_v34  ;;  %v771_v38 = vmul.f32 %v1191_v36, %v746_v18  ;;  %v764_v39 = vadd.f32 %v763_v35, %v762_v33 }
 0x44f   : > { %v785_v40 = vmul.f32 %v1179_v52, %v780_v37  ;;  %v776_v41 = vsub.f32 2.0, %v771_v38  ;;  %1196 = vrcp.f32 %v764_v39 }
 0x450   : > { %v1193_v42 = vpop.eup %1192 }
 0x451   : > { %v790_v43 = vmul.f32 %v785_v40, %v1582_v9  ;;  %v772_v44 = vmul.f32 %v1193_v42, %v752_v26  ;;  %v781_v45 = vmul.f32 %v1191_v36, %v776_v41 }
 0x453   : > { %v777_v47 = vsub.f32 2.0, %v772_v44  ;;  %v786_v48 = vmul.f32 %v1181_v58, %v781_v45  ;;  %v803_v54 = vadd.f32 %v801_v46, %v790_v43 }
 0x454   : > { %v1195_v49 = vpop.eup %1194 }
 0x455   : > { %v773_v50 = vmul.f32 %v1195_v49, %v758_v31  ;;  %v782_v51 = vmul.f32 %v1193_v42, %v777_v47  ;;  %v791_v53 = vmul.f32 %v786_v48, %v1585_v12  ;;  %v809_v9 = vsel %vm808_vm4, %v803_v54, 0.0 }
 0x457   : > { %v778_v55 = vsub.f32 2.0, %v773_v50  ;;  %v787_v56 = vmul.f32 %v1183_v0, %v782_v51  ;;  %v804_v52 = vadd.f32 %v801_v46, %v791_v53 }
 0x459   : > { %v1197_v57 = vpop.eup %1196  ;;  %v783_v59 = vmul.f32 %v1195_v49, %v778_v55  ;;  %v792_v60 = vmul.f32 %v787_v56, %v1588_v15  ;;  %v810_v61 = vsel %vm808_vm4, %v804_v52, 0.0 }
 0x45a   : > { %v774_v62 = vmul.f32 %v1197_v57, %v764_v39  ;;  %v811_v58 = vadd.f32 %v810_v61, %v809_v9 }
 0x45b   : > { %v788_v63 = vmul.f32 %v1185_v11, %v783_v59  ;;  %v805_v4 = vadd.f32 %v801_v46, %v792_v60 }
 0x45c   : > { %v779_v5 = vsub.f32 2.0, %v774_v62 }
 0x45d   : > { %v793_v12 = vmul.f32 %v788_v63, %v1591_v17  ;;  %v812_v6 = vsel %vm808_vm4, %v805_v4, 0.0 }
 0x45e   : > { %v784_v7 = vmul.f32 %v1197_v57, %v779_v5  ;;  %v813_v0 = vadd.f32 %v812_v6, %v811_v58 }
 0x45f   : > { %v806_v8 = vadd.f32 %v801_v46, %v793_v12 }
 0x460   : > { %v789_v10 = vmul.f32 %v1187_v20, %v784_v7 }
 0x461   : > { %v814_v13 = vsel %vm808_vm4, %v806_v8, 0.0 }
 0x462   : > { %v794_v15 = vmul.f32 %v789_v10, %v1594_v22  ;;  %v815_v14 = vadd.f32 %v814_v13, %v813_v0 }
 0x464   : > { %v807_v16 = vadd.f32 %v801_v46, %v794_v15 }
 0x466   : > { %v816_v1 = vsel %vm808_vm4, %v807_v16, 0.0 }
 0x467   : > { %v817_v11 = vadd.f32 %v816_v1, %v815_v14 }
 0x469   : > { %v818_v18 = vmul.f32 0.2, %v817_v11 }
 0x46b   : > { %833 = vrot.lane.b32.xlu1 %v818_v18, %s1340_s7  ;;  %v819_v17 = vsel %vm808_vm4, %v818_v18, 0.0 }
 0x46c   : > { %v820_v19 = vrot.slane %v819_v17, 4 }
 0x46e   : > { %v821_v21 = vadd.f32 %v820_v19, %v819_v17 }
 0x470   : > { %v822_v23 = vrot.slane %v821_v21, 2 }
 0x472   : > { %v823_v20 = vadd.f32 %v822_v23, %v821_v21 }
 0x474   : > { %v824_v24 = vrot.slane %v823_v20, 1 }
 0x476   : > { %v825_v26 = vadd.f32 %v824_v24, %v823_v20 }
 0x478   : > { %v831_v22 = vsub.f32 %v825_v26, %v829_v25 }
 0x47a   : > { %v841_v27 = vrot.slane %v831_v22, %v797_v3 }
 0x47c   : > { %843 = vrot.lane.b32.xlu1 %v841_v27, %s1340_s7 }
 0x4dd   : > { %v834_v28 = vpop.permute.xlu1 %833 }
 0x4de   : > { %837 = vst.msk [vmem:[%s241_s26] sm:$0xff] %vm836_vm5, %v834_v28 }
 0x4ee   : > { %v844_v29 = vpop.permute.xlu1 %843 }
 0x4ef   : > { %846 = vst.msk [vmem:[%s241_s26 + $0x8] sm:$0xff] %vm836_vm5, %v844_v29 }
 0x4f0 PF: > { %p16_p9 = scmp.ge.s32.totalorder %s1405_s22, 4   ;;  %s1658_s12 = smov %s1320_s13 }
 0x4f1   : > { %s1659_s13 = smov %s1324_s14  ;;  %s1660_s14 = smov %s1434_s10 }
 0x4f2   : > { %s1661_s15 = smov %s1405_s22  ;;  %18 = sbr.rel (!%p16_p9) target bundleno = 5 (0x5), region = 89 }
 0x4f9   :  { %868 = vsyncpa [#allocation3], 1 }
 0x4fa   :  { %870 = vsyncpa [#allocation3 + $0x1], 1 }
 0x4fb   :  { %871 = vsyncpa [#allocation5], 1 }
 0x4fc   :  { %873 = vsyncpa [#allocation5 + $0x1], 1 }

</bundles_post_ra>
